<compile_context>
chip_gen: v7x
topology: tpu7x:2x2x1
jax: 0.10.0
libtpu: 0.0.40
codegen_flags: <defaults>
</compile_context>

<pallas_src>
import jax
import jax.numpy as jnp
from jax.experimental import pallas as pl
from jax.experimental.pallas import tpu as pltpu


# ---------------- Pallas kernels ----------------

def conv_stats_kernel(p_ref, w_ref, o_ref, sum_ref, sq_ref):
    # Fused: (tm, K) @ (K, Cp) -> (tm, Cp) conv tile, plus per-channel
    # sum / sum-of-squares accumulated while the tile is still live.
    @pl.when(pl.program_id(0) == 0)
    def _():
        sum_ref[...] = jnp.zeros_like(sum_ref)
        sq_ref[...] = jnp.zeros_like(sq_ref)

    acc = jnp.dot(p_ref[...], w_ref[...], preferred_element_type=jnp.float32)
    o_ref[...] = acc.astype(o_ref.dtype)
    # Padded rows (zero patches) and padded channels (zero weight columns)
    # contribute exactly zero to both sums -> no correction needed afterwards.
    sum_ref[...] += jnp.sum(acc, axis=0, keepdims=True)
    sq_ref[...] += jnp.sum(acc * acc, axis=0, keepdims=True)


def bn_relu_kernel(x_ref, scale_ref, shift_ref, o_ref):
    # y = relu(x * scale + shift), BN folded into per-channel scale/shift.
    x = x_ref[...].astype(jnp.float32)
    y = x * scale_ref[...] + shift_ref[...]
    o_ref[...] = jnp.maximum(y, 0.0).astype(o_ref.dtype)


# ---------------- glue: im2col (plain JAX, layout plumbing only) ----------------
# TODO(synk): for large layers, gather patches in-kernel (manual DMA of shifted
# NHWC windows) instead of materializing the KH*KW-times-larger array in HBM.

def im2col(x, kh, kw, stride, padding):
    N, C, H, W = x.shape
    xp = jnp.pad(x, ((0, 0), (0, 0), (padding, padding), (padding, padding)))
    OH = (H + 2 * padding - kh) // stride + 1
    OW = (W + 2 * padding - kw) // stride + 1
    cols = []
    for i in range(kh):
        for j in range(kw):
            cols.append(
                xp[:, :, i:i + (OH - 1) * stride + 1:stride,
                          j:j + (OW - 1) * stride + 1:stride]
            )
    # (KH, KW, N, C, OH, OW) -> (N, OH, OW, C, KH, KW) -> (M, K)  [K ordered (ci, kh, kw)]
    p = jnp.stack(cols, axis=0).reshape(kh, kw, N, C, OH, OW)
    p = p.transpose(2, 4, 5, 3, 0, 1)
    return p.reshape(N * OH * OW, C * kh * kw), OH, OW


# ---------------- wrapper ----------------

def conv_bn_relu(x, w, b, gamma, beta, *, stride=1, padding=0, eps=1e-5,
                 tm=512, lane_multiple=128, compute_dtype=jnp.float32):
    # NOTE: `b` (conv bias) is accepted for API parity with nn.Conv2d but is not
    # applied: a per-channel constant cancels exactly under training-mode BN.
    del b
    N, Cin, H, W = x.shape
    Cout, _, KH, KW = w.shape

    patches, OH, OW = im2col(x.astype(jnp.float32), KH, KW, stride, padding)
    M, K = patches.shape

    Mp = pl.cdiv(M, tm) * tm                       # row padding to tile multiple
    Cp = pl.cdiv(Cout, lane_multiple) * lane_multiple  # lane-dense channel padding

    patches = jnp.pad(patches, ((0, Mp - M), (0, 0))).astype(compute_dtype)
    wm = jnp.pad(w.reshape(Cout, K).T.astype(jnp.float32),
                 ((0, 0), (0, Cp - Cout))).astype(compute_dtype)   # (K, Cp)

    grid = (Mp // tm,)

    # VMEM budget: double-buffered (tm,K)+(tm,Cp) streams + resident (K,Cp) weight
    # + small stats blocks. Cap at 48 MiB so the same tiling stays safe on v7x
    # (64 MiB physical VMEM) while allowing headroom on v5e/v6e.
    est_vmem = 4 * (2 * tm * (K + Cp) + K * Cp + 8 * Cp)
    vmem_limit = int(min(max(2 * est_vmem, 16 * 2 ** 20), 48 * 2 ** 20))

    # --- pass 1: conv matmul fused with BN batch statistics ---
    conv_out, s, sq = pl.pallas_call(
        conv_stats_kernel,
        out_shape=(
            jax.ShapeDtypeStruct((Mp, Cp), compute_dtype),   # conv intermediate
            jax.ShapeDtypeStruct((1, Cp), jnp.float32),      # per-channel sum
            jax.ShapeDtypeStruct((1, Cp), jnp.float32),      # per-channel sum of squares
        ),
        grid=grid,
        in_specs=[
            pl.BlockSpec((tm, K), lambda i: (i, 0)),
            pl.BlockSpec((K, Cp), lambda i: (0, 0)),
        ],
        out_specs=(
            pl.BlockSpec((tm, Cp), lambda i: (i, 0)),
            pl.BlockSpec((1, Cp), lambda i: (0, 0)),         # resident accumulator
            pl.BlockSpec((1, Cp), lambda i: (0, 0)),         # resident accumulator
        ),
        compiler_params=pltpu.CompilerParams(
            # M axis carries the resident stats accumulators -> "arbitrary".
            dimension_semantics=("arbitrary",),
            vmem_limit_bytes=vmem_limit,
        ),
    )(patches, wm)

    # --- tiny host-side epilogue: fold BN into per-channel scale / shift ---
    mean = s / M
    var = sq / M - mean * mean          # biased variance (training-mode BN)
    # Single-pass E[x^2]-E[x]^2 in f32; with the bias dropped the conv output is
    # near zero-mean, which avoids the worst cancellation regime.
    inv_std = jax.lax.rsqrt(var + eps)
    g = jnp.pad(gamma.astype(jnp.float32).reshape(1, Cout), ((0, 0), (0, Cp - Cout)))
    be = jnp.pad(beta.astype(jnp.float32).reshape(1, Cout), ((0, 0), (0, Cp - Cout)))
    scale = g * inv_std                 # (1, Cp)
    shift = be - mean * scale           # (1, Cp)

    # --- pass 2: normalize + affine + ReLU (elementwise, megacore-parallel) ---
    out = pl.pallas_call(
        bn_relu_kernel,
        out_shape=jax.ShapeDtypeStruct((Mp, Cp), jnp.float32),
        grid=grid,
        in_specs=[
            pl.BlockSpec((tm, Cp), lambda i: (i, 0)),
            pl.BlockSpec((1, Cp), lambda i: (0, 0)),
            pl.BlockSpec((1, Cp), lambda i: (0, 0)),
        ],
        out_specs=pl.BlockSpec((tm, Cp), lambda i: (i, 0)),
        compiler_params=pltpu.CompilerParams(
            dimension_semantics=("parallel",),
            vmem_limit_bytes=vmem_limit,
        ),
    )(conv_out, scale, shift)

    # back to NCHW, dropping row / channel padding
    return out[:M, :Cout].reshape(N, OH, OW, Cout).transpose(0, 3, 1, 2)


# ---------------- pure-JAX reference (for verification) ----------------

def conv_bn_relu_ref(x, w, b, gamma, beta, *, stride, padding, eps=1e-5):
    conv = jax.lax.conv_general_dilated(
        x, w, window_strides=(stride, stride),
        padding=[(padding, padding), (padding, padding)],
        dimension_numbers=("NCHW", "OIHW", "NCHW"),
    ) + b.reshape(1, -1, 1, 1)
    mean = conv.mean(axis=(0, 2, 3), keepdims=True)
    var = conv.var(axis=(0, 2, 3), keepdims=True)       # biased, like BN training mode
    y = (conv - mean) * jax.lax.rsqrt(var + eps) * gamma.reshape(1, -1, 1, 1) \
        + beta.reshape(1, -1, 1, 1)
    return jnp.maximum(y, 0.0)


if __name__ == "__main__":
    # ConvBNReLU(in_channels=4, out_channels=8, kernel_size=3, stride=1, padding=1)
    in_channels, out_channels, kernel_size, stride, padding = 4, 8, 3, 1, 1

    key = jax.random.PRNGKey(0)
    kx, kw, kb, kg, kbe = jax.random.split(key, 5)
    x = jax.random.normal(kx, (2, in_channels, 16, 16), dtype=jnp.float32)
    w = 0.1 * jax.random.normal(kw, (out_channels, in_channels, kernel_size, kernel_size),
                                dtype=jnp.float32)
    b = 0.1 * jax.random.normal(kb, (out_channels,), dtype=jnp.float32)
    gamma = 1.0 + 0.1 * jax.random.normal(kg, (out_channels,), dtype=jnp.float32)
    beta = 0.1 * jax.random.normal(kbe, (out_channels,), dtype=jnp.float32)

    out = conv_bn_relu(x, w, b, gamma, beta, stride=stride, padding=padding)
    out = jax.block_until_ready(out)

    ref = conv_bn_relu_ref(x, w, b, gamma, beta, stride=stride, padding=padding)
    assert out.shape == ref.shape == (2, out_channels, 16, 16)
    assert jnp.allclose(out, ref, atol=1e-3, rtol=1e-3), \
        f"max abs err {jnp.max(jnp.abs(out - ref))}"

    print("KERNEL_OK")
</pallas_src>

<mosaic_0001>
module attributes {stable_mosaic.version = 11 : i64} {
  func.func @conv_stats_kernel(%arg0: i32, %arg1: memref<512x36xf32, #tpu.memory_space<vmem>>, %arg2: memref<36x128xf32, #tpu.memory_space<vmem>>, %arg3: memref<512x128xf32, #tpu.memory_space<vmem>>, %arg4: memref<1x128xf32, #tpu.memory_space<vmem>>, %arg5: memref<1x128xf32, #tpu.memory_space<vmem>>) attributes {dimension_semantics = [#tpu.dimension_semantics<arbitrary>], iteration_bounds = array<i64: 1>, scalar_prefetch = 0 : i64, scratch_operands = 0 : i64, tpu.core_type = #tpu.core_type<tc>, window_params = [{transform_indices = @transform_0, window_bounds = array<i64: 512, 36>}, {pipeline_mode = #tpu.pipeline_mode<synchronous>, transform_indices = @transform_1, window_bounds = array<i64: 36, 128>}, {transform_indices = @transform_2, window_bounds = array<i64: 512, 128>}, {pipeline_mode = #tpu.pipeline_mode<synchronous>, transform_indices = @transform_3, window_bounds = array<i64: 1, 128>}, {pipeline_mode = #tpu.pipeline_mode<synchronous>, transform_indices = @transform_4, window_bounds = array<i64: 1, 128>}]} {
    %c0_i32 = arith.constant 0 : i32
    %0 = arith.cmpi eq, %arg0, %c0_i32 : i32
    %1 = arith.extui %0 : i1 to i32
    %c0_i32_0 = arith.constant 0 : i32
    %2 = arith.cmpi ne, %1, %c0_i32_0 : i32
    scf.if %2 {
      %cst_16 = arith.constant 0.000000e+00 : f32
      %18 = vector.broadcast %cst_16 : f32 to vector<1x128xf32>
      %c0_17 = arith.constant 0 : index
      %c0_18 = arith.constant 0 : index
      %19 = vector.load %arg4[%c0_17, %c0_18] : memref<1x128xf32, #tpu.memory_space<vmem>>, vector<1x128xf32>
      tpu.vector_store %arg4[%c0_17, %c0_18], %18 {strides = array<i32>} : memref<1x128xf32, #tpu.memory_space<vmem>>, vector<1x128xf32>,
      %cst_19 = arith.constant 0.000000e+00 : f32
      %20 = vector.broadcast %cst_19 : f32 to vector<1x128xf32>
      %c0_20 = arith.constant 0 : index
      %c0_21 = arith.constant 0 : index
      %21 = vector.load %arg5[%c0_20, %c0_21] : memref<1x128xf32, #tpu.memory_space<vmem>>, vector<1x128xf32>
      tpu.vector_store %arg5[%c0_20, %c0_21], %20 {strides = array<i32>} : memref<1x128xf32, #tpu.memory_space<vmem>>, vector<1x128xf32>,
    } else {
    }
    %c0 = arith.constant 0 : index
    %c0_1 = arith.constant 0 : index
    %3 = vector.load %arg1[%c0, %c0_1] : memref<512x36xf32, #tpu.memory_space<vmem>>, vector<512x36xf32>
    %c0_2 = arith.constant 0 : index
    %c0_3 = arith.constant 0 : index
    %4 = vector.load %arg2[%c0_2, %c0_3] : memref<36x128xf32, #tpu.memory_space<vmem>>, vector<36x128xf32>
    %cst = arith.constant dense<0.000000e+00> : vector<512x128xf32>
    %5 = tpu.matmul %3, %4, %cst {dimension_numbers = #tpu.dot_dimension_numbers<[1], [0], [0], [1], [0, 0, 1, 1], [], []>} : vector<512x36xf32>, vector<36x128xf32>, vector<512x128xf32> -> vector<512x128xf32>
    %c0_4 = arith.constant 0 : index
    %c0_5 = arith.constant 0 : index
    %6 = vector.load %arg3[%c0_4, %c0_5] : memref<512x128xf32, #tpu.memory_space<vmem>>, vector<512x128xf32>
    tpu.vector_store %arg3[%c0_4, %c0_5], %5 {strides = array<i32>} : memref<512x128xf32, #tpu.memory_space<vmem>>, vector<512x128xf32>,
    %c0_6 = arith.constant 0 : index
    %c0_7 = arith.constant 0 : index
    %7 = vector.load %arg4[%c0_6, %c0_7] : memref<1x128xf32, #tpu.memory_space<vmem>>, vector<1x128xf32>
    %cst_8 = arith.constant dense<0.000000e+00> : vector<128xf32>
    %8 = vector.multi_reduction <add>, %5, %cst_8 [0] : vector<512x128xf32> to vector<128xf32>
    %9 = vector.shape_cast %8 : vector<128xf32> to vector<1x128xf32>
    %10 = arith.addf %7, %9 : vector<1x128xf32>
    %c0_9 = arith.constant 0 : index
    %c0_10 = arith.constant 0 : index
    %11 = vector.load %arg4[%c0_9, %c0_10] : memref<1x128xf32, #tpu.memory_space<vmem>>, vector<1x128xf32>
    tpu.vector_store %arg4[%c0_9, %c0_10], %10 {strides = array<i32>} : memref<1x128xf32, #tpu.memory_space<vmem>>, vector<1x128xf32>,
    %c0_11 = arith.constant 0 : index
    %c0_12 = arith.constant 0 : index
    %12 = vector.load %arg5[%c0_11, %c0_12] : memref<1x128xf32, #tpu.memory_space<vmem>>, vector<1x128xf32>
    %13 = arith.mulf %5, %5 : vector<512x128xf32>
    %cst_13 = arith.constant dense<0.000000e+00> : vector<128xf32>
    %14 = vector.multi_reduction <add>, %13, %cst_13 [0] : vector<512x128xf32> to vector<128xf32>
    %15 = vector.shape_cast %14 : vector<128xf32> to vector<1x128xf32>
    %16 = arith.addf %12, %15 : vector<1x128xf32>
    %c0_14 = arith.constant 0 : index
    %c0_15 = arith.constant 0 : index
    %17 = vector.load %arg5[%c0_14, %c0_15] : memref<1x128xf32, #tpu.memory_space<vmem>>, vector<1x128xf32>
    tpu.vector_store %arg5[%c0_14, %c0_15], %16 {strides = array<i32>} : memref<1x128xf32, #tpu.memory_space<vmem>>, vector<1x128xf32>,
    return
  }
  func.func @transform_0(%arg0: i32) -> (i32, i32) {
    %c0_i32 = arith.constant 0 : i32
    %c0_i32_0 = arith.constant 0 : i32
    return %arg0, %c0_i32 : i32, i32
  }
  func.func @transform_1(%arg0: i32) -> (i32, i32) {
    %c0_i32 = arith.constant 0 : i32
    %c0_i32_0 = arith.constant 0 : i32
    %c0_i32_1 = arith.constant 0 : i32
    return %c0_i32, %c0_i32_0 : i32, i32
  }
  func.func @transform_2(%arg0: i32) -> (i32, i32) {
    %c0_i32 = arith.constant 0 : i32
    %c0_i32_0 = arith.constant 0 : i32
    return %arg0, %c0_i32 : i32, i32
  }
  func.func @transform_3(%arg0: i32) -> (i32, i32) {
    %c0_i32 = arith.constant 0 : i32
    %c0_i32_0 = arith.constant 0 : i32
    %c0_i32_1 = arith.constant 0 : i32
    return %c0_i32, %c0_i32_0 : i32, i32
  }
  func.func @transform_4(%arg0: i32) -> (i32, i32) {
    %c0_i32 = arith.constant 0 : i32
    %c0_i32_0 = arith.constant 0 : i32
    %c0_i32_1 = arith.constant 0 : i32
    return %c0_i32, %c0_i32_0 : i32, i32
  }
}

</mosaic_0001>

<bundles_post_ra>
// kernel: tpu_custom_call.1
= control target key start
LH: loop header
LB: loop body
LE: loop exit
PB: predicated region body
PF: predicated region fallthrough
CT: control target
= control target key end

     0   :  { %10 = vsyncpa [#allocation3], 0  ;;  %vm91_vm0 = vcmask 293888   ;;  %vm284_vm1 = vcmask 1043456   ;;  %s1863_s0 = inlined_call_operand.vmem [shape: f32[512,36], index: 0, kind: input, shape index: {}]   ;;  %s1864_s1 = inlined_call_operand.vmem [shape: f32[36,128], index: 1, kind: input, shape index: {}]   ;;  %s1865_s2 = inlined_call_operand.hbm [shape: f32[512,128], index: 2, kind: output, shape index: {0}]   ;;  %s1866_s3 = inlined_call_operand.hbm [shape: f32[1,128], index: 3, kind: output, shape index: {1}]   ;;  %s1867_s4 = inlined_call_operand.hbm [shape: f32[1,128], index: 4, kind: output, shape index: {2}]  }
   0x1   :  { %v86_v0 = vld [vmem:[%s1864_s1] sm:$0xff]  ;;  %v87_v1 = vld [vmem:[%s1864_s1 + $0x8] sm:$0xff]  ;;  %v88_v2 = vld [vmem:[%s1864_s1 + $0x10] sm:$0xff] }
   0x2   :  { %v1228_v3 = vpack.c.bf16 %v87_v1, %v86_v0  ;;  %v89_v4 = vld [vmem:[%s1864_s1 + $0x18] sm:$0xff]  ;;  %v22_v5 = vld [vmem:[%s1863_s0] sm:$0xff]  ;;  %v23_v8 = vld [vmem:[%s1863_s0 + $0x8] sm:$0xff] }
   0x3   :  { %v1232_v6 = vpack.c.bf16 %v89_v4, %v88_v2  ;;  %1132 = vmatprep.mubr.msk.f32.mxu0 %vm91_vm0, %v22_v5  ;;  %v90_v7 = vld [vmem:[%s1864_s1 + $0x20] sm:$0xf]  ;;  %v24_v9 = vld [vmem:[%s1863_s0 + $0x10] sm:$0xff]  ;;  %v55_v11 = vld [vmem:[%s1863_s0 + $0x108] sm:$0xff] }
   0x4   :  { %1229 = vmatprep.subr.bf16.mxu0 %v1228_v3  ;;  %1236 = vmatprep.subr.bf16.mxu1 %v1228_v3  ;;  %v54_v10 = vld [vmem:[%s1863_s0 + $0x100] sm:$0xff]  ;;  %v56_v12 = vld [vmem:[%s1863_s0 + $0x110] sm:$0xff]  ;;  %v25_v13 = vld [vmem:[%s1863_s0 + $0x18] sm:$0xff] }
   0x5   :  { %1231 = vmatpush3.bf16.msra.mxu0 %v1228_v3  ;;  %1239 = vmatpush3.bf16.msra.mxu1 %v1228_v3  ;;  %v26_v14 = vld [vmem:[%s1863_s0 + $0x20] sm:$0xff]  ;;  %v57_v15 = vld [vmem:[%s1863_s0 + $0x118] sm:$0xff]  ;;  %v27_v17 = vld [vmem:[%s1863_s0 + $0x28] sm:$0xff] }
   0x6   :  { %1233 = vmatprep.subr.bf16.mxu0 %v1232_v6  ;;  %1237 = vmatprep.subr.bf16.mxu1 %v1232_v6  ;;  %v58_v16 = vld [vmem:[%s1863_s0 + $0x120] sm:$0xff]  ;;  %v28_v18 = vld [vmem:[%s1863_s0 + $0x30] sm:$0xff]  ;;  %v59_v19 = vld [vmem:[%s1863_s0 + $0x128] sm:$0xff] }
   0x7   :  { %1180 = vmatprep.mubr.msk.f32.mxu1 %vm91_vm0, %v54_v10  ;;  %v60_v20 = vld [vmem:[%s1863_s0 + $0x130] sm:$0xff]  ;;  %v29_v21 = vld [vmem:[%s1863_s0 + $0x38] sm:$0xff]  ;;  %v30_v22 = vld [vmem:[%s1863_s0 + $0x40] sm:$0xff] }
   0x8   :  { %v61_v23 = vld [vmem:[%s1863_s0 + $0x138] sm:$0xff] }
   0x9   :  { %1235 = vmatpush3.bf16.msra.mxu0 %v1232_v6  ;;  %1240 = vmatpush3.bf16.msra.mxu1 %v1232_v6 }
   0xa   :  { %1130 = vmatprep.subr.msk.mxu0 %vm284_vm1, %v90_v7  ;;  %1238 = vmatprep.subr.msk.mxu1 %vm284_vm1, %v90_v7 }
   0xd   :  { %1131 = vmatpush3.msk.msra.mxu0 %vm284_vm1, %v90_v7  ;;  %1241 = vmatpush3.msk.msra.mxu1 %vm284_vm1, %v90_v7 }
   0xe   :  { %1133 = vmatmul.mubr.msk.f32.vlgmr.msra.gmra.mrb[0].mxu0 %vm91_vm0, %v23_v8  ;;  %1181 = vmatmul.mubr.msk.f32.vlgmr.msra.gmra.mrb[0].mxu1 %vm91_vm0, %v55_v11 }
   0xf   :  { %1135 = vmatprep.mubr.msk.f32.mxu0 %vm91_vm0, %v24_v9  ;;  %1183 = vmatprep.mubr.msk.f32.mxu1 %vm91_vm0, %v56_v12 }
  0x12   :  { %1136 = vmatmul.mubr.msk.f32.gmra.mrb[2].mxu0 %vm91_vm0, %v25_v13  ;;  %1184 = vmatmul.mubr.msk.f32.gmra.mrb[2].mxu1 %vm91_vm0, %v57_v15 }
  0x13   :  { %1138 = vmatprep.mubr.msk.f32.mxu0 %vm91_vm0, %v26_v14  ;;  %1186 = vmatprep.mubr.msk.f32.mxu1 %vm91_vm0, %v58_v16 }
  0x16   :  { %1139 = vmatmul.mubr.msk.f32.gmra.mrb[4].mxu0 %vm91_vm0, %v27_v17  ;;  %1187 = vmatmul.mubr.msk.f32.gmra.mrb[4].mxu1 %vm91_vm0, %v59_v19 }
  0x17   :  { %1141 = vmatprep.mubr.msk.f32.mxu0 %vm91_vm0, %v28_v18  ;;  %1189 = vmatprep.mubr.msk.f32.mxu1 %vm91_vm0, %v60_v20 }
  0x18   :  { %11 = vsyncpa [#allocation5], 0  ;;  %v62_v24 = vld [vmem:[%s1863_s0 + $0x140] sm:$0xff]  ;;  %v31_v25 = vld [vmem:[%s1863_s0 + $0x48] sm:$0xff] }
  0x19   :  { %v32_v26 = vld [vmem:[%s1863_s0 + $0x50] sm:$0xff]  ;;  %v63_v27 = vld [vmem:[%s1863_s0 + $0x148] sm:$0xff]  ;;  %v33_v29 = vld [vmem:[%s1863_s0 + $0x58] sm:$0xff] }
  0x1a   :  { %1142 = vmatmul.mubr.msk.f32.gmra.mrb[6].mxu0 %vm91_vm0, %v29_v21  ;;  %1190 = vmatmul.mubr.msk.f32.gmra.mrb[6].mxu1 %vm91_vm0, %v61_v23  ;;  %v64_v28 = vld [vmem:[%s1863_s0 + $0x150] sm:$0xff]  ;;  %v34_v30 = vld [vmem:[%s1863_s0 + $0x60] sm:$0xff]  ;;  %v65_v31 = vld [vmem:[%s1863_s0 + $0x158] sm:$0xff]  ;;  %v1318_v21 = vmov 0.0  }
  0x1b   :  { %1144 = vmatprep.mubr.msk.f32.mxu0 %vm91_vm0, %v30_v22  ;;  %1192 = vmatprep.mubr.msk.f32.mxu1 %vm91_vm0, %v62_v24  ;;  %v66_v32 = vld [vmem:[%s1863_s0 + $0x160] sm:$0xff]  ;;  %v35_v33 = vld [vmem:[%s1863_s0 + $0x68] sm:$0xff]  ;;  %v36_v34 = vld [vmem:[%s1863_s0 + $0x70] sm:$0xff]  ;;  %20 = vst [vmem:[#allocation4] sm:$0x1] %v1318_v21 }
  0x1c   :  { %v67_v35 = vld [vmem:[%s1863_s0 + $0x168] sm:$0xff]  ;;  %v68_v36 = vld [vmem:[%s1863_s0 + $0x170] sm:$0xff]  ;;  %v37_v37 = vld [vmem:[%s1863_s0 + $0x78] sm:$0xff]  ;;  %21 = vst [vmem:[#allocation6] sm:$0x1] %v1318_v21 }
  0x1d   :  { %v38_v38 = vld [vmem:[%s1863_s0 + $0x80] sm:$0xff]  ;;  %v69_v39 = vld [vmem:[%s1863_s0 + $0x178] sm:$0xff]  ;;  %v39_v41 = vld [vmem:[%s1863_s0 + $0x88] sm:$0xff] }
  0x1e   :  { %1145 = vmatmul.mubr.msk.f32.gmra.mrb[8].mxu0 %vm91_vm0, %v31_v25  ;;  %1193 = vmatmul.mubr.msk.f32.gmra.mrb[8].mxu1 %vm91_vm0, %v63_v27  ;;  %v70_v40 = vld [vmem:[%s1863_s0 + $0x180] sm:$0xff]  ;;  %v40_v42 = vld [vmem:[%s1863_s0 + $0x90] sm:$0xff]  ;;  %v71_v43 = vld [vmem:[%s1863_s0 + $0x188] sm:$0xff] }
  0x1f   :  { %1147 = vmatprep.mubr.msk.f32.mxu0 %vm91_vm0, %v32_v26  ;;  %1195 = vmatprep.mubr.msk.f32.mxu1 %vm91_vm0, %v64_v28  ;;  %v72_v44 = vld [vmem:[%s1863_s0 + $0x190] sm:$0xff]  ;;  %v41_v45 = vld [vmem:[%s1863_s0 + $0x98] sm:$0xff]  ;;  %v42_v46 = vld [vmem:[%s1863_s0 + $0xa0] sm:$0xff] }
  0x20   :  { %v73_v47 = vld [vmem:[%s1863_s0 + $0x198] sm:$0xff]  ;;  %v74_v48 = vld [vmem:[%s1863_s0 + $0x1a0] sm:$0xff]  ;;  %v43_v49 = vld [vmem:[%s1863_s0 + $0xa8] sm:$0xff] }
  0x21   :  { %v44_v50 = vld [vmem:[%s1863_s0 + $0xb0] sm:$0xff]  ;;  %v75_v51 = vld [vmem:[%s1863_s0 + $0x1a8] sm:$0xff]  ;;  %v45_v53 = vld [vmem:[%s1863_s0 + $0xb8] sm:$0xff] }
  0x22   :  { %1148 = vmatmul.mubr.msk.f32.gmra.mrb[10].mxu0 %vm91_vm0, %v33_v29  ;;  %1196 = vmatmul.mubr.msk.f32.gmra.mrb[10].mxu1 %vm91_vm0, %v65_v31  ;;  %v76_v52 = vld [vmem:[%s1863_s0 + $0x1b0] sm:$0xff]  ;;  %v46_v54 = vld [vmem:[%s1863_s0 + $0xc0] sm:$0xff]  ;;  %v77_v55 = vld [vmem:[%s1863_s0 + $0x1b8] sm:$0xff] }
  0x23   :  { %1150 = vmatprep.mubr.msk.f32.mxu0 %vm91_vm0, %v34_v30  ;;  %1198 = vmatprep.mubr.msk.f32.mxu1 %vm91_vm0, %v66_v32  ;;  %v78_v56 = vld [vmem:[%s1863_s0 + $0x1c0] sm:$0xff]  ;;  %v47_v57 = vld [vmem:[%s1863_s0 + $0xc8] sm:$0xff]  ;;  %v48_v58 = vld [vmem:[%s1863_s0 + $0xd0] sm:$0xff] }
  0x24   :  { %v79_v59 = vld [vmem:[%s1863_s0 + $0x1c8] sm:$0xff]  ;;  %v80_v60 = vld [vmem:[%s1863_s0 + $0x1d0] sm:$0xff]  ;;  %v49_v61 = vld [vmem:[%s1863_s0 + $0xd8] sm:$0xff] }
  0x25   :  { %v50_v62 = vld [vmem:[%s1863_s0 + $0xe0] sm:$0xff]  ;;  %v81_v63 = vld [vmem:[%s1863_s0 + $0x1d8] sm:$0xff]  ;;  %v51_v1 = vld [vmem:[%s1863_s0 + $0xe8] sm:$0xff] }
  0x26   :  { %1151 = vmatmul.mubr.msk.f32.gmra.mrb[12].mxu0 %vm91_vm0, %v35_v33  ;;  %1199 = vmatmul.mubr.msk.f32.gmra.mrb[12].mxu1 %vm91_vm0, %v67_v35  ;;  %v82_v0 = vld [vmem:[%s1863_s0 + $0x1e0] sm:$0xff]  ;;  %v52_v2 = vld [vmem:[%s1863_s0 + $0xf0] sm:$0xff]  ;;  %v83_v3 = vld [vmem:[%s1863_s0 + $0x1e8] sm:$0xff] }
  0x27   :  { %1153 = vmatprep.mubr.msk.f32.mxu0 %vm91_vm0, %v36_v34  ;;  %1201 = vmatprep.mubr.msk.f32.mxu1 %vm91_vm0, %v68_v36  ;;  %v84_v4 = vld [vmem:[%s1863_s0 + $0x1f0] sm:$0xff]  ;;  %v53_v5 = vld [vmem:[%s1863_s0 + $0xf8] sm:$0xff] }
  0x28   :  { %v85_v6 = vld [vmem:[%s1863_s0 + $0x1f8] sm:$0xff]  ;;  %s1319_s0 = smov [#allocation2]  }
  0x29   :  { %s950_s18 = sshll.u32 %s1319_s0, 4  ;;  %s1710_s18 = int_to_ptr.vmem [resolvable:$true] %s950_s18 }
  0x2a   :  { %1154 = vmatmul.mubr.msk.f32.gmra.mrb[14].mxu0 %vm91_vm0, %v37_v37  ;;  %1202 = vmatmul.mubr.msk.f32.gmra.mrb[14].mxu1 %vm91_vm0, %v69_v39  ;;  %s1248_s19 = scalar_lea.vmem %s1710_s18, 8192  ;;  %p1253_p1 = scmp.lt.s32.totalorder %s1710_s18, %s1710_s18 }
  0x2b   :  { %1156 = vmatprep.mubr.msk.f32.mxu0 %vm91_vm0, %v38_v38  ;;  %1204 = vmatprep.mubr.msk.f32.mxu1 %vm91_vm0, %v70_v40  ;;  %p1249_p0 = scmp.ne.s32.totalorder %s1710_s18, %s1248_s19  ;;  %p1254_p2 = scmp.lt.s32.totalorder %s1248_s19, %s1248_s19 }
  0x2d   :  { %p1255_p3 = por %p1254_p2, %p1253_p1 }
  0x2e   :  { %1157 = vmatmul.mubr.msk.f32.gmra.mrb[16].mxu0 %vm91_vm0, %v39_v41  ;;  %1205 = vmatmul.mubr.msk.f32.gmra.mrb[16].mxu1 %vm91_vm0, %v71_v43 }
  0x2f   :  { %1159 = vmatprep.mubr.msk.f32.mxu0 %vm91_vm0, %v40_v42  ;;  %1207 = vmatprep.mubr.msk.f32.mxu1 %vm91_vm0, %v72_v44  ;;  %p1256_p4 = pnand %p1255_p3, %p1249_p0 }
  0x32   :  { %1160 = vmatmul.mubr.msk.f32.gmra.mrb[18].mxu0 %vm91_vm0, %v41_v45  ;;  %1208 = vmatmul.mubr.msk.f32.gmra.mrb[18].mxu1 %vm91_vm0, %v73_v47 }
  0x33   :  { %1162 = vmatprep.mubr.msk.f32.mxu0 %vm91_vm0, %v42_v46  ;;  %1210 = vmatprep.mubr.msk.f32.mxu1 %vm91_vm0, %v74_v48 }
  0x36   :  { %1163 = vmatmul.mubr.msk.f32.gmra.mrb[20].mxu0 %vm91_vm0, %v43_v49  ;;  %1211 = vmatmul.mubr.msk.f32.gmra.mrb[20].mxu1 %vm91_vm0, %v75_v51 }
  0x37   :  { %1165 = vmatprep.mubr.msk.f32.mxu0 %vm91_vm0, %v44_v50  ;;  %1213 = vmatprep.mubr.msk.f32.mxu1 %vm91_vm0, %v76_v52 }
  0x3a   :  { %1166 = vmatmul.mubr.msk.f32.gmra.mrb[22].mxu0 %vm91_vm0, %v45_v53  ;;  %1214 = vmatmul.mubr.msk.f32.gmra.mrb[22].mxu1 %vm91_vm0, %v77_v55 }
  0x3b   :  { %1168 = vmatprep.mubr.msk.f32.mxu0 %vm91_vm0, %v46_v54  ;;  %1216 = vmatprep.mubr.msk.f32.mxu1 %vm91_vm0, %v78_v56 }
  0x3e   :  { %1169 = vmatmul.mubr.msk.f32.gmra.mrb[24].mxu0 %vm91_vm0, %v47_v57  ;;  %1217 = vmatmul.mubr.msk.f32.gmra.mrb[24].mxu1 %vm91_vm0, %v79_v59 }
  0x3f   :  { %1171 = vmatprep.mubr.msk.f32.mxu0 %vm91_vm0, %v48_v58  ;;  %1219 = vmatprep.mubr.msk.f32.mxu1 %vm91_vm0, %v80_v60 }
  0x42   :  { %1172 = vmatmul.mubr.msk.f32.gmra.mrb[26].mxu0 %vm91_vm0, %v49_v61  ;;  %1220 = vmatmul.mubr.msk.f32.gmra.mrb[26].mxu1 %vm91_vm0, %v81_v63 }
  0x43   :  { %1174 = vmatprep.mubr.msk.f32.mxu0 %vm91_vm0, %v50_v62  ;;  %1222 = vmatprep.mubr.msk.f32.mxu1 %vm91_vm0, %v82_v0 }
  0x46   :  { %1175 = vmatmul.mubr.msk.f32.gmra.mrb[28].mxu0 %vm91_vm0, %v51_v1  ;;  %1223 = vmatmul.mubr.msk.f32.gmra.mrb[28].mxu1 %vm91_vm0, %v83_v3 }
  0x47   :  { %1177 = vmatprep.mubr.msk.f32.mxu0 %vm91_vm0, %v52_v2  ;;  %1225 = vmatprep.mubr.msk.f32.mxu1 %vm91_vm0, %v84_v4 }
  0x4a   :  { %1178 = vmatmul.mubr.msk.f32.gmra.mrb[30].mxu0 %vm91_vm0, %v53_v5  ;;  %1226 = vmatmul.mubr.msk.f32.gmra.mrb[30].mxu1 %vm91_vm0, %v85_v6 }
  0xe1   :  { %v1134_v7 = vpop.f32.mrb[0].mxu0  ;;  %v1620_v10 = vpop.f32.mrb[0].mxu1 }
  0xe2   :  { %674 = vst [vmem:[#allocation2 + $0x8] sm:$0xff] %v1134_v7  ;;  %v811_v8 = vmul.f32 %v1134_v7, %v1134_v7  ;;  %v354_v9 = vpop.f32.mrb[1].mxu0  ;;  %706 = vst [vmem:[#allocation2 + $0x108] sm:$0xff] %v1620_v10  ;;  %v1623_v13 = vpop.f32.mrb[1].mxu1 }
  0xe3   :  { %673 = vst [vmem:[#allocation2] sm:$0xff] %v354_v9  ;;  %v738_v11 = vadd.f32 %v1134_v7, %v354_v9  ;;  %v810_v12 = vmul.f32 %v354_v9, %v354_v9  ;;  %705 = vst [vmem:[#allocation2 + $0x100] sm:$0xff] %v1623_v13 }
  0xe5   :  { %v874_v14 = vadd.f32 %v811_v8, %v810_v12  ;;  %v1137_v15 = vpop.f32.mrb[2].mxu0  ;;  %v1626_v17 = vpop.f32.mrb[2].mxu1 }
  0xe6   :  { %676 = vst [vmem:[#allocation2 + $0x18] sm:$0xff] %v1137_v15  ;;  %v364_v16 = vpop.f32.mrb[3].mxu0  ;;  %708 = vst [vmem:[#allocation2 + $0x118] sm:$0xff] %v1626_v17  ;;  %v1629_v20 = vpop.f32.mrb[3].mxu1  ;;  %v813_v22 = vmul.f32 %v1137_v15, %v1137_v15 }
  0xe7   :  { %675 = vst [vmem:[#allocation2 + $0x10] sm:$0xff] %v364_v16  ;;  %v739_v18 = vadd.f32 %v738_v11, %v364_v16  ;;  %v812_v19 = vmul.f32 %v364_v16, %v364_v16  ;;  %707 = vst [vmem:[#allocation2 + $0x110] sm:$0xff] %v1629_v20 }
  0xe9   :  { %v875_v23 = vadd.f32 %v874_v14, %v812_v19  ;;  %v1140_v24 = vpop.f32.mrb[4].mxu0  ;;  %v740_v25 = vadd.f32 %v1137_v15, %v739_v18  ;;  %v1632_v27 = vpop.f32.mrb[4].mxu1 }
  0xea   :  { %678 = vst [vmem:[#allocation2 + $0x28] sm:$0xff] %v1140_v24  ;;  %v374_v26 = vpop.f32.mrb[5].mxu0  ;;  %710 = vst [vmem:[#allocation2 + $0x128] sm:$0xff] %v1632_v27  ;;  %v1635_v31 = vpop.f32.mrb[5].mxu1  ;;  %v815_v32 = vmul.f32 %v1140_v24, %v1140_v24 }
  0xeb   :  { %677 = vst [vmem:[#allocation2 + $0x20] sm:$0xff] %v374_v26  ;;  %v741_v28 = vadd.f32 %v740_v25, %v374_v26  ;;  %v814_v29 = vmul.f32 %v374_v26, %v374_v26  ;;  %v876_v30 = vadd.f32 %v875_v23, %v813_v22  ;;  %709 = vst [vmem:[#allocation2 + $0x120] sm:$0xff] %v1635_v31 }
  0xed   :  { %v877_v33 = vadd.f32 %v876_v30, %v814_v29  ;;  %v1143_v34 = vpop.f32.mrb[6].mxu0  ;;  %v742_v35 = vadd.f32 %v1140_v24, %v741_v28  ;;  %v1638_v37 = vpop.f32.mrb[6].mxu1 }
  0xee   :  { %680 = vst [vmem:[#allocation2 + $0x38] sm:$0xff] %v1143_v34  ;;  %v384_v36 = vpop.f32.mrb[7].mxu0  ;;  %712 = vst [vmem:[#allocation2 + $0x138] sm:$0xff] %v1638_v37  ;;  %v1641_v41 = vpop.f32.mrb[7].mxu1  ;;  %v817_v42 = vmul.f32 %v1143_v34, %v1143_v34 }
  0xef   :  { %679 = vst [vmem:[#allocation2 + $0x30] sm:$0xff] %v384_v36  ;;  %v743_v38 = vadd.f32 %v742_v35, %v384_v36  ;;  %v816_v39 = vmul.f32 %v384_v36, %v384_v36  ;;  %v878_v40 = vadd.f32 %v877_v33, %v815_v32  ;;  %711 = vst [vmem:[#allocation2 + $0x130] sm:$0xff] %v1641_v41 }
  0xf1   :  { %v879_v43 = vadd.f32 %v878_v40, %v816_v39  ;;  %v1146_v44 = vpop.f32.mrb[8].mxu0  ;;  %v744_v45 = vadd.f32 %v1143_v34, %v743_v38  ;;  %v1644_v47 = vpop.f32.mrb[8].mxu1 }
  0xf2   :  { %682 = vst [vmem:[#allocation2 + $0x48] sm:$0xff] %v1146_v44  ;;  %v394_v46 = vpop.f32.mrb[9].mxu0  ;;  %714 = vst [vmem:[#allocation2 + $0x148] sm:$0xff] %v1644_v47  ;;  %v1647_v51 = vpop.f32.mrb[9].mxu1  ;;  %v819_v52 = vmul.f32 %v1146_v44, %v1146_v44 }
  0xf3   :  { %681 = vst [vmem:[#allocation2 + $0x40] sm:$0xff] %v394_v46  ;;  %v745_v48 = vadd.f32 %v744_v45, %v394_v46  ;;  %v818_v49 = vmul.f32 %v394_v46, %v394_v46  ;;  %v880_v50 = vadd.f32 %v879_v43, %v817_v42  ;;  %713 = vst [vmem:[#allocation2 + $0x140] sm:$0xff] %v1647_v51 }
  0xf5   :  { %v881_v53 = vadd.f32 %v880_v50, %v818_v49  ;;  %v1149_v54 = vpop.f32.mrb[10].mxu0  ;;  %v746_v55 = vadd.f32 %v1146_v44, %v745_v48  ;;  %v1650_v57 = vpop.f32.mrb[10].mxu1 }
  0xf6   :  { %684 = vst [vmem:[#allocation2 + $0x58] sm:$0xff] %v1149_v54  ;;  %v404_v56 = vpop.f32.mrb[11].mxu0  ;;  %716 = vst [vmem:[#allocation2 + $0x158] sm:$0xff] %v1650_v57  ;;  %v1653_v61 = vpop.f32.mrb[11].mxu1  ;;  %v821_v62 = vmul.f32 %v1149_v54, %v1149_v54 }
  0xf7   :  { %683 = vst [vmem:[#allocation2 + $0x50] sm:$0xff] %v404_v56  ;;  %v747_v58 = vadd.f32 %v746_v55, %v404_v56  ;;  %v820_v59 = vmul.f32 %v404_v56, %v404_v56  ;;  %v882_v60 = vadd.f32 %v881_v53, %v819_v52  ;;  %715 = vst [vmem:[#allocation2 + $0x150] sm:$0xff] %v1653_v61 }
  0xf9   :  { %v883_v63 = vadd.f32 %v882_v60, %v820_v59  ;;  %v1152_v0 = vpop.f32.mrb[12].mxu0  ;;  %v748_v1 = vadd.f32 %v1149_v54, %v747_v58  ;;  %v1656_v3 = vpop.f32.mrb[12].mxu1 }
  0xfa   :  { %686 = vst [vmem:[#allocation2 + $0x68] sm:$0xff] %v1152_v0  ;;  %v414_v2 = vpop.f32.mrb[13].mxu0  ;;  %718 = vst [vmem:[#allocation2 + $0x168] sm:$0xff] %v1656_v3  ;;  %v1659_v7 = vpop.f32.mrb[13].mxu1  ;;  %v823_v8 = vmul.f32 %v1152_v0, %v1152_v0 }
  0xfb   :  { %685 = vst [vmem:[#allocation2 + $0x60] sm:$0xff] %v414_v2  ;;  %v749_v4 = vadd.f32 %v748_v1, %v414_v2  ;;  %v822_v5 = vmul.f32 %v414_v2, %v414_v2  ;;  %v884_v6 = vadd.f32 %v883_v63, %v821_v62  ;;  %717 = vst [vmem:[#allocation2 + $0x160] sm:$0xff] %v1659_v7 }
  0xfd   :  { %v885_v9 = vadd.f32 %v884_v6, %v822_v5  ;;  %v1155_v11 = vpop.f32.mrb[14].mxu0  ;;  %v750_v12 = vadd.f32 %v1152_v0, %v749_v4  ;;  %v1662_v15 = vpop.f32.mrb[14].mxu1 }
  0xfe   :  { %688 = vst [vmem:[#allocation2 + $0x78] sm:$0xff] %v1155_v11  ;;  %v424_v14 = vpop.f32.mrb[15].mxu0  ;;  %720 = vst [vmem:[#allocation2 + $0x178] sm:$0xff] %v1662_v15  ;;  %v1665_v21 = vpop.f32.mrb[15].mxu1  ;;  %v825_v22 = vmul.f32 %v1155_v11, %v1155_v11 }
  0xff   :  { %687 = vst [vmem:[#allocation2 + $0x70] sm:$0xff] %v424_v14  ;;  %v751_v16 = vadd.f32 %v750_v12, %v424_v14  ;;  %v824_v18 = vmul.f32 %v424_v14, %v424_v14  ;;  %v886_v19 = vadd.f32 %v885_v9, %v823_v8  ;;  %719 = vst [vmem:[#allocation2 + $0x170] sm:$0xff] %v1665_v21 }
 0x101   :  { %v887_v23 = vadd.f32 %v886_v19, %v824_v18  ;;  %v1158_v24 = vpop.f32.mrb[16].mxu0  ;;  %v752_v25 = vadd.f32 %v1155_v11, %v751_v16  ;;  %v1668_v28 = vpop.f32.mrb[16].mxu1 }
 0x102   :  { %690 = vst [vmem:[#allocation2 + $0x88] sm:$0xff] %v1158_v24  ;;  %v434_v26 = vpop.f32.mrb[17].mxu0  ;;  %722 = vst [vmem:[#allocation2 + $0x188] sm:$0xff] %v1668_v28  ;;  %v1671_v33 = vpop.f32.mrb[17].mxu1  ;;  %v827_v34 = vmul.f32 %v1158_v24, %v1158_v24 }
 0x103   :  { %689 = vst [vmem:[#allocation2 + $0x80] sm:$0xff] %v434_v26  ;;  %v753_v29 = vadd.f32 %v752_v25, %v434_v26  ;;  %v826_v30 = vmul.f32 %v434_v26, %v434_v26  ;;  %v888_v32 = vadd.f32 %v887_v23, %v825_v22  ;;  %721 = vst [vmem:[#allocation2 + $0x180] sm:$0xff] %v1671_v33 }
 0x105   :  { %v889_v35 = vadd.f32 %v888_v32, %v826_v30  ;;  %v1161_v36 = vpop.f32.mrb[18].mxu0  ;;  %v754_v38 = vadd.f32 %v1158_v24, %v753_v29  ;;  %v1674_v40 = vpop.f32.mrb[18].mxu1 }
 0x106   :  { %692 = vst [vmem:[#allocation2 + $0x98] sm:$0xff] %v1161_v36  ;;  %v444_v39 = vpop.f32.mrb[19].mxu0  ;;  %724 = vst [vmem:[#allocation2 + $0x198] sm:$0xff] %v1674_v40  ;;  %v1677_v45 = vpop.f32.mrb[19].mxu1  ;;  %v829_v46 = vmul.f32 %v1161_v36, %v1161_v36 }
 0x107   :  { %691 = vst [vmem:[#allocation2 + $0x90] sm:$0xff] %v444_v39  ;;  %v755_v42 = vadd.f32 %v754_v38, %v444_v39  ;;  %v828_v43 = vmul.f32 %v444_v39, %v444_v39  ;;  %v890_v44 = vadd.f32 %v889_v35, %v827_v34  ;;  %723 = vst [vmem:[#allocation2 + $0x190] sm:$0xff] %v1677_v45 }
 0x109   :  { %v891_v48 = vadd.f32 %v890_v44, %v828_v43  ;;  %v1164_v49 = vpop.f32.mrb[20].mxu0  ;;  %v756_v50 = vadd.f32 %v1161_v36, %v755_v42  ;;  %v1680_v53 = vpop.f32.mrb[20].mxu1 }
 0x10a   :  { %694 = vst [vmem:[#allocation2 + $0xa8] sm:$0xff] %v1164_v49  ;;  %v454_v52 = vpop.f32.mrb[21].mxu0  ;;  %726 = vst [vmem:[#allocation2 + $0x1a8] sm:$0xff] %v1680_v53  ;;  %v1683_v58 = vpop.f32.mrb[21].mxu1  ;;  %v831_v59 = vmul.f32 %v1164_v49, %v1164_v49 }
 0x10b   :  { %693 = vst [vmem:[#allocation2 + $0xa0] sm:$0xff] %v454_v52  ;;  %v757_v54 = vadd.f32 %v756_v50, %v454_v52  ;;  %v830_v55 = vmul.f32 %v454_v52, %v454_v52  ;;  %v892_v56 = vadd.f32 %v891_v48, %v829_v46  ;;  %725 = vst [vmem:[#allocation2 + $0x1a0] sm:$0xff] %v1683_v58 }
 0x10d   :  { %v893_v60 = vadd.f32 %v892_v56, %v830_v55  ;;  %v1167_v62 = vpop.f32.mrb[22].mxu0  ;;  %v758_v63 = vadd.f32 %v1164_v49, %v757_v54  ;;  %v1686_v1 = vpop.f32.mrb[22].mxu1 }
 0x10e   :  { %696 = vst [vmem:[#allocation2 + $0xb8] sm:$0xff] %v1167_v62  ;;  %v464_v0 = vpop.f32.mrb[23].mxu0  ;;  %728 = vst [vmem:[#allocation2 + $0x1b8] sm:$0xff] %v1686_v1  ;;  %v1689_v6 = vpop.f32.mrb[23].mxu1  ;;  %v833_v8 = vmul.f32 %v1167_v62, %v1167_v62 }
 0x10f   :  { %695 = vst [vmem:[#allocation2 + $0xb0] sm:$0xff] %v464_v0  ;;  %v759_v2 = vadd.f32 %v758_v63, %v464_v0  ;;  %v832_v4 = vmul.f32 %v464_v0, %v464_v0  ;;  %v894_v5 = vadd.f32 %v893_v60, %v831_v59  ;;  %727 = vst [vmem:[#allocation2 + $0x1b0] sm:$0xff] %v1689_v6 }
 0x111   :  { %v895_v9 = vadd.f32 %v894_v5, %v832_v4  ;;  %v1170_v11 = vpop.f32.mrb[24].mxu0  ;;  %v760_v12 = vadd.f32 %v1167_v62, %v759_v2  ;;  %v1692_v16 = vpop.f32.mrb[24].mxu1 }
 0x112   :  { %698 = vst [vmem:[#allocation2 + $0xc8] sm:$0xff] %v1170_v11  ;;  %v474_v14 = vpop.f32.mrb[25].mxu0  ;;  %730 = vst [vmem:[#allocation2 + $0x1c8] sm:$0xff] %v1692_v16  ;;  %v1695_v23 = vpop.f32.mrb[25].mxu1  ;;  %v835_v24 = vmul.f32 %v1170_v11, %v1170_v11 }
 0x113   :  { %697 = vst [vmem:[#allocation2 + $0xc0] sm:$0xff] %v474_v14  ;;  %v761_v18 = vadd.f32 %v760_v12, %v474_v14  ;;  %v834_v19 = vmul.f32 %v474_v14, %v474_v14  ;;  %v896_v22 = vadd.f32 %v895_v9, %v833_v8  ;;  %729 = vst [vmem:[#allocation2 + $0x1c0] sm:$0xff] %v1695_v23 }
 0x114   :  { %v842_v12 = vmul.f32 %v1623_v13, %v1623_v13 }
 0x115   :  { %v897_v25 = vadd.f32 %v896_v22, %v834_v19  ;;  %v1173_v26 = vpop.f32.mrb[26].mxu0  ;;  %v762_v29 = vadd.f32 %v1170_v11, %v761_v18  ;;  %v1698_v32 = vpop.f32.mrb[26].mxu1 }
 0x116   :  { %700 = vst [vmem:[#allocation2 + $0xd8] sm:$0xff] %v1173_v26  ;;  %v484_v30 = vpop.f32.mrb[27].mxu0  ;;  %732 = vst [vmem:[#allocation2 + $0x1d8] sm:$0xff] %v1698_v32  ;;  %v1701_v38 = vpop.f32.mrb[27].mxu1  ;;  %v837_v39 = vmul.f32 %v1173_v26, %v1173_v26 }
 0x117   :  { %699 = vst [vmem:[#allocation2 + $0xd0] sm:$0xff] %v484_v30  ;;  %v763_v34 = vadd.f32 %v762_v29, %v484_v30  ;;  %v836_v35 = vmul.f32 %v484_v30, %v484_v30  ;;  %v898_v36 = vadd.f32 %v897_v25, %v835_v24  ;;  %731 = vst [vmem:[#allocation2 + $0x1d0] sm:$0xff] %v1701_v38 }
 0x119   :  { %v899_v42 = vadd.f32 %v898_v36, %v836_v35  ;;  %v1176_v43 = vpop.f32.mrb[28].mxu0  ;;  %v764_v44 = vadd.f32 %v1173_v26, %v763_v34  ;;  %v1704_v48 = vpop.f32.mrb[28].mxu1 }
 0x11a   :  { %702 = vst [vmem:[#allocation2 + $0xe8] sm:$0xff] %v1176_v43  ;;  %v494_v46 = vpop.f32.mrb[29].mxu0  ;;  %734 = vst [vmem:[#allocation2 + $0x1e8] sm:$0xff] %v1704_v48  ;;  %v1707_v54 = vpop.f32.mrb[29].mxu1  ;;  %v839_v55 = vmul.f32 %v1176_v43, %v1176_v43 }
 0x11b   :  { %701 = vst [vmem:[#allocation2 + $0xe0] sm:$0xff] %v494_v46  ;;  %v765_v49 = vadd.f32 %v764_v44, %v494_v46  ;;  %v838_v50 = vmul.f32 %v494_v46, %v494_v46  ;;  %v900_v52 = vadd.f32 %v899_v42, %v837_v39  ;;  %733 = vst [vmem:[#allocation2 + $0x1e0] sm:$0xff] %v1707_v54 }
 0x11d   :  { %v901_v56 = vadd.f32 %v900_v52, %v838_v50  ;;  %v1179_v59 = vpop.f32.mrb[30].mxu0  ;;  %v766_v60 = vadd.f32 %v1176_v43, %v765_v49  ;;  %v1712_v63 = vpop.f32.mrb[30].mxu1 }
 0x11e   :  { %704 = vst [vmem:[#allocation2 + $0xf8] sm:$0xff] %v1179_v59  ;;  %v504_v62 = vpop.f32.mrb[31].mxu0  ;;  %736 = vst [vmem:[#allocation2 + $0x1f8] sm:$0xff] %v1712_v63  ;;  %v1715_v5 = vpop.f32.mrb[31].mxu1  ;;  %v841_v8 = vmul.f32 %v1179_v59, %v1179_v59 }
 0x11f   :  { %703 = vst [vmem:[#allocation2 + $0xf0] sm:$0xff] %v504_v62  ;;  %v767_v0 = vadd.f32 %v766_v60, %v504_v62  ;;  %v840_v2 = vmul.f32 %v504_v62, %v504_v62  ;;  %v902_v4 = vadd.f32 %v901_v56, %v839_v55  ;;  %735 = vst [vmem:[#allocation2 + $0x1f0] sm:$0xff] %v1715_v5 }
 0x121   :  { %v768_v9 = vadd.f32 %v1179_v59, %v767_v0  ;;  %v903_v11 = vadd.f32 %v902_v4, %v840_v2 }
 0x122   :  { %1259 = shalt.err (!%p1256_p4)
}
 0x123   :  { %s1260_s22 = scalar_lea.hbm %s1865_s2, 8192 }
 0x124   :  { %p1261_p5 = scmp.ne.s32.totalorder %s1865_s2, %s1260_s22  ;;  %p1264_p6 = scmp.lt.u32.totalorder %s1260_s22, %s1865_s2 }
 0x126   :  { %p1266_p7 = pnand %p1264_p6, %p1261_p5 }
 0x128   :  { %1269 = shalt.err (!%p1266_p7)
}
 0x129   :  { %s1320_s27 = smov 128   ;;  %s1321_s28 = smov 8   ;;  %v904_v14 = vadd.f32 %v903_v11, %v841_v8  ;;  %v769_v18 = vadd.f32 %v768_v9, %v1623_v13  ;;  %v843_v19 = vmul.f32 %v1620_v10, %v1620_v10  ;;  %v844_v25 = vmul.f32 %v1629_v20, %v1629_v20 }
 0x12a   :  { %956 = dma.vmem_to_hbm [thread:$0]  %s1710_s18, 8192, %s1865_s2, [#allocation3], %s1320_s27, %s1320_s27, %s1321_s28   ;;  %v845_v30 = vmul.f32 %v1626_v17, %v1626_v17  ;;  %v846_v13 = vmul.f32 %v1635_v31, %v1635_v31 }
 0x12b   :  { %v905_v22 = vadd.f32 %v904_v14, %v842_v12  ;;  %v770_v24 = vadd.f32 %v1620_v10, %v769_v18  ;;  %v847_v10 = vmul.f32 %v1632_v27, %v1632_v27  ;;  %s1322_s2 = smov [#allocation4]   ;;  %s1323_s6 = smov [#allocation6]  }
 0x12c   :  { %s963_s5 = sshll.u32 %s1322_s2, 4  ;;  %s973_s1 = sshll.u32 %s1323_s6, 4  ;;  %s964_s5 = int_to_ptr.vmem [resolvable:$true] %s963_s5  ;;  %s1831_s1 = int_to_ptr.vmem [resolvable:$true] %s973_s1 }
 0x12d   :  { %v771_v26 = vadd.f32 %v770_v24, %v1629_v20  ;;  %v906_v29 = vadd.f32 %v905_v22, %v843_v19  ;;  %v848_v20 = vmul.f32 %v1641_v41, %v1641_v41  ;;  %s1270_s7 = scalar_lea.vmem %s964_s5, 16  ;;  %s1274_s8 = scalar_lea.vmem %s964_s5, 32 }
 0x12e   :  { %p1271_p8 = scmp.ne.s32.totalorder %s964_s5, %s1270_s7  ;;  %p1275_p9 = scmp.lt.s32.totalorder %s964_s5, %s964_s5 }
 0x12f   :  { %v907_v34 = vadd.f32 %v906_v29, %v844_v25  ;;  %v772_v35 = vadd.f32 %v1626_v17, %v771_v26  ;;  %v849_v17 = vmul.f32 %v1638_v37, %v1638_v37  ;;  %p1276_p10 = scmp.lt.s32.totalorder %s1274_s8, %s1270_s7 }
 0x131   :  { %v773_v36 = vadd.f32 %v772_v35, %v1635_v31  ;;  %v908_v39 = vadd.f32 %v907_v34, %v845_v30  ;;  %v850_v31 = vmul.f32 %v1647_v51, %v1647_v51  ;;  %p1277_p11 = por %p1276_p10, %p1275_p9 }
 0x133   :  { %v909_v42 = vadd.f32 %v908_v39, %v846_v13  ;;  %v774_v43 = vadd.f32 %v1632_v27, %v773_v36  ;;  %v851_v27 = vmul.f32 %v1644_v47, %v1644_v47  ;;  %p1278_p12 = pnand %p1277_p11, %p1271_p8 }
 0x135   :  { %v775_v44 = vadd.f32 %v774_v43, %v1641_v41  ;;  %v910_v46 = vadd.f32 %v909_v42, %v847_v10  ;;  %v852_v41 = vmul.f32 %v1653_v61, %v1653_v61 }
 0x137   :  { %v911_v49 = vadd.f32 %v910_v46, %v848_v20  ;;  %v776_v50 = vadd.f32 %v1638_v37, %v775_v44  ;;  %v853_v37 = vmul.f32 %v1650_v57, %v1650_v57 }
 0x139   :  { %v777_v52 = vadd.f32 %v776_v50, %v1647_v51  ;;  %v912_v55 = vadd.f32 %v911_v49, %v849_v17  ;;  %v854_v51 = vmul.f32 %v1659_v7, %v1659_v7 }
 0x13b   :  { %v913_v56 = vadd.f32 %v912_v55, %v850_v31  ;;  %v778_v59 = vadd.f32 %v1644_v47, %v777_v52  ;;  %v855_v47 = vmul.f32 %v1656_v3, %v1656_v3 }
 0x13d   :  { %v779_v60 = vadd.f32 %v778_v59, %v1653_v61  ;;  %v914_v62 = vadd.f32 %v913_v56, %v851_v27  ;;  %v856_v61 = vmul.f32 %v1665_v21, %v1665_v21 }
 0x13f   :  { %v915_v0 = vadd.f32 %v914_v62, %v852_v41  ;;  %v780_v2 = vadd.f32 %v1650_v57, %v779_v60  ;;  %v857_v57 = vmul.f32 %v1662_v15, %v1662_v15 }
 0x141   :  { %v781_v4 = vadd.f32 %v780_v2, %v1659_v7  ;;  %v916_v8 = vadd.f32 %v915_v0, %v853_v37  ;;  %v858_v7 = vmul.f32 %v1671_v33, %v1671_v33 }
 0x143   :  { %v917_v9 = vadd.f32 %v916_v8, %v854_v51  ;;  %v782_v11 = vadd.f32 %v1656_v3, %v781_v4  ;;  %v859_v3 = vmul.f32 %v1668_v28, %v1668_v28 }
 0x145   :  { %v783_v12 = vadd.f32 %v782_v11, %v1665_v21  ;;  %v918_v14 = vadd.f32 %v917_v9, %v855_v47  ;;  %v860_v21 = vmul.f32 %v1677_v45, %v1677_v45 }
 0x147   :  { %v919_v18 = vadd.f32 %v918_v14, %v856_v61  ;;  %v784_v19 = vadd.f32 %v1662_v15, %v783_v12  ;;  %v861_v15 = vmul.f32 %v1674_v40, %v1674_v40  ;;  %v737_v14 = vld [vmem:[#allocation4] sm:$0x1] }
 0x149   :  { %v785_v22 = vadd.f32 %v784_v19, %v1671_v33  ;;  %v920_v24 = vadd.f32 %v919_v18, %v857_v57  ;;  %v862_v33 = vmul.f32 %v1683_v58, %v1683_v58  ;;  %v809_v18 = vld [vmem:[#allocation6] sm:$0x1] }
 0x14b   :  { %v921_v25 = vadd.f32 %v920_v24, %v858_v7  ;;  %v786_v26 = vadd.f32 %v1668_v28, %v785_v22  ;;  %v863_v28 = vmul.f32 %v1680_v53, %v1680_v53 }
 0x14d   :  { %v787_v29 = vadd.f32 %v786_v26, %v1677_v45  ;;  %v922_v30 = vadd.f32 %v921_v25, %v859_v3  ;;  %v864_v45 = vmul.f32 %v1689_v6, %v1689_v6 }
 0x14f   :  { %v923_v34 = vadd.f32 %v922_v30, %v860_v21  ;;  %v788_v35 = vadd.f32 %v1674_v40, %v787_v29  ;;  %v865_v40 = vmul.f32 %v1686_v1, %v1686_v1 }
 0x151   :  { %v789_v13 = vadd.f32 %v788_v35, %v1683_v58  ;;  %v924_v36 = vadd.f32 %v923_v34, %v861_v15  ;;  %v866_v58 = vmul.f32 %v1695_v23, %v1695_v23 }
 0x153   :  { %v925_v39 = vadd.f32 %v924_v36, %v862_v33  ;;  %v790_v10 = vadd.f32 %v1680_v53, %v789_v13  ;;  %v867_v53 = vmul.f32 %v1692_v16, %v1692_v16 }
 0x155   :  { %v791_v42 = vadd.f32 %v790_v10, %v1689_v6  ;;  %v926_v43 = vadd.f32 %v925_v39, %v863_v28  ;;  %v868_v6 = vmul.f32 %v1701_v38, %v1701_v38 }
 0x157   :  { %v927_v20 = vadd.f32 %v926_v43, %v864_v45  ;;  %v792_v44 = vadd.f32 %v1686_v1, %v791_v42  ;;  %v869_v1 = vmul.f32 %v1698_v32, %v1698_v32 }
 0x159   :  { %v793_v46 = vadd.f32 %v792_v44, %v1695_v23  ;;  %v928_v17 = vadd.f32 %v927_v20, %v865_v40  ;;  %v870_v23 = vmul.f32 %v1707_v54, %v1707_v54 }
 0x15b   :  { %v929_v49 = vadd.f32 %v928_v17, %v866_v58  ;;  %v794_v50 = vadd.f32 %v1692_v16, %v793_v46  ;;  %v871_v16 = vmul.f32 %v1704_v48, %v1704_v48 }
 0x15d   :  { %v795_v31 = vadd.f32 %v794_v50, %v1701_v38  ;;  %v930_v52 = vadd.f32 %v929_v49, %v867_v53  ;;  %v872_v38 = vmul.f32 %v1715_v5, %v1715_v5 }
 0x15f   :  { %v931_v55 = vadd.f32 %v930_v52, %v868_v6  ;;  %v796_v27 = vadd.f32 %v1698_v32, %v795_v31  ;;  %v873_v32 = vmul.f32 %v1712_v63, %v1712_v63 }
 0x161   :  { %v797_v56 = vadd.f32 %v796_v27, %v1707_v54  ;;  %v932_v59 = vadd.f32 %v931_v55, %v869_v1 }
 0x163   :  { %v933_v41 = vadd.f32 %v932_v59, %v870_v23  ;;  %v798_v60 = vadd.f32 %v1704_v48, %v797_v56 }
 0x165   :  { %v799_v62 = vadd.f32 %v798_v60, %v1715_v5  ;;  %v934_v37 = vadd.f32 %v933_v41, %v871_v16 }
 0x167   :  { %v800_v0 = vadd.f32 %v1712_v63, %v799_v62  ;;  %v935_v2 = vadd.f32 %v934_v37, %v872_v38 }
 0x169   :  { %v801_v54 = vrot.slane %v800_v0, 4  ;;  %v936_v51 = vadd.f32 %v935_v2, %v873_v32 }
 0x16b   :  { %v802_v4 = vadd.f32 %v801_v54, %v800_v0  ;;  %v937_v8 = vrot.slane %v936_v51, 4 }
 0x16d   :  { %v803_v47 = vrot.slane %v802_v4, 2  ;;  %v938_v9 = vadd.f32 %v937_v8, %v936_v51 }
 0x16f   :  { %v804_v11 = vadd.f32 %v803_v47, %v802_v4  ;;  %v939_v48 = vrot.slane %v938_v9, 2 }
 0x171   :  { %v805_v61 = vrot.slane %v804_v11, 1  ;;  %v940_v12 = vadd.f32 %v939_v48, %v938_v9 }
 0x173   :  { %v806_v5 = vadd.f32 %v805_v61, %v804_v11  ;;  %v941_v57 = vrot.slane %v940_v12, 1 }
 0x175   :  { %v807_v63 = vadd.f32 %v806_v5, %v737_v14  ;;  %v942_v19 = vadd.f32 %v941_v57, %v940_v12 }
 0x177   :  { %808 = vst [vmem:[#allocation4] sm:$0x1] %v807_v63  ;;  %v943_v7 = vadd.f32 %v942_v19, %v809_v18 }
 0x178   :  { %1281 = shalt.err (!%p1278_p12)
}
 0x179   :  { %s1282_s11 = scalar_lea.hbm %s1866_s3, 16 }
 0x17a   :  { %p1283_p13 = scmp.ne.s32.totalorder %s1866_s3, %s1282_s11  ;;  %p1286_p0 = scmp.lt.u32.totalorder %s1282_s11, %s1866_s3 }
 0x17c   :  { %p1288_p1 = pnand %p1286_p0, %p1283_p13 }
 0x17e   :  { %1291 = shalt.err (!%p1288_p1)
}
 0x17f   :  { %966 = dma.vmem_to_hbm [thread:$0]  %s964_s5, 16, %s1866_s3, [#allocation5]   ;;  %944 = vst [vmem:[#allocation6] sm:$0x1] %v943_v7 }
 0x180   :  { %s1292_s0 = scalar_lea.vmem %s1831_s1, 16  ;;  %s1296_s18 = scalar_lea.vmem %s1831_s1, 32 }
 0x181   :  { %p1293_p2 = scmp.ne.s32.totalorder %s1831_s1, %s1292_s0  ;;  %p1297_p3 = scmp.lt.s32.totalorder %s1831_s1, %s1831_s1 }
 0x182   :  { %p1298_p4 = scmp.lt.s32.totalorder %s1296_s18, %s1292_s0 }
 0x184   :  { %p1299_p5 = por %p1298_p4, %p1297_p3 }
 0x186   :  { %p1300_p6 = pnand %p1299_p5, %p1293_p2 }
 0x188   :  { %1303 = shalt.err (!%p1300_p6)
}
 0x189   :  { %s1304_s21 = scalar_lea.hbm %s1867_s4, 16 }
 0x18a   :  { %p1305_p7 = scmp.ne.s32.totalorder %s1867_s4, %s1304_s21  ;;  %p1308_p8 = scmp.lt.u32.totalorder %s1304_s21, %s1867_s4 }
 0x18c   :  { %p1310_p9 = pnand %p1308_p8, %p1305_p7 }
 0x18e   :  { %1313 = shalt.err (!%p1310_p9)
}
 0x18f   :  { %976 = dma.vmem_to_hbm [thread:$0]  %s1831_s1, 16, %s1867_s4, [#allocation5]  }
 0x190   :  { %1314 = dma.done.wait [#allocation3], 8192  }
 0x191   :  { %1315 = vsyncadd [#allocation3], 4294959104 }
 0x192   :  { %1316 = dma.done.wait [#allocation5], 32  }
 0x193   :  { %1317 = vsyncadd [#allocation5], 4294967264 }
 0x194   :  { %986 = vsyncpa [#allocation3], 1 }
 0x195   :  { %987 = vsyncpa [#allocation5], 1 }

</bundles_post_ra>
